<compile_context>
chip_gen: v7x
topology: tpu7x:2x2x1
jax: 0.10.0
libtpu: 0.0.40
codegen_flags: <defaults>
</compile_context>

<pallas_src>
import functools
import math

import jax
import jax.numpy as jnp
import numpy as np
from jax.experimental import pallas as pl
from jax.experimental.pallas import tpu as pltpu


_VMEM_LIMIT_BYTES = 32 * 1024 * 1024     # raise v5e's 16 MiB scoped default
_VMEM_BUDGET_BYTES = 24 * 1024 * 1024    # what we let the kernel actually use
_TARGET_BLOCK_BYTES = 2 << 20            # ~2 MiB of input per grid step


def _sublane_multiple(dtype):
    # Packed-sublane multiple for sub-32-bit dtypes (bf16 -> 16, int8 -> 32).
    return {4: 8, 2: 16, 1: 32}.get(jnp.dtype(dtype).itemsize, 8)


def _choose_block_bg(bg, cpg, hw, dtype):
    """How many (batch, group) slices per grid step (must divide bg)."""
    itemsize = jnp.dtype(dtype).itemsize
    sub = _sublane_multiple(dtype)
    slice_bytes = max(cpg * hw * itemsize, 1)
    f32_tile = cpg * hw * 4

    def vmem_est(d):
        # 2x-buffered in + out blocks, ~3 full-tile f32 temps (x, y, gate_rows),
        # plus the two resident selection matrices.
        return d * (4 * slice_bytes + 3 * f32_tile) + d * d * cpg * 8

    divisors = [d for d in range(1, bg + 1) if bg % d == 0]
    # Row count of a block must be a multiple of the sublane packing factor,
    # unless the block is the full row extent (always legal).
    valid = [d for d in divisors if (d * cpg) % sub == 0 or d == bg]
    if not valid:
        valid = [bg]

    fits = [d for d in valid
            if d * slice_bytes <= _TARGET_BLOCK_BYTES and vmem_est(d) <= _VMEM_BUDGET_BYTES]
    if not fits:
        # Even the smallest legal block exceeds the target: take the smallest.
        # TODO(synk): for cpg*hw*itemsize >> 2 MiB per slice a two-pass
        # hw-chunked grid axis is needed instead of whole-slice blocks.
        return min(valid)

    total_bytes = bg * slice_bytes
    if total_bytes >= (16 << 20):
        # Big enough that pipelining / megacore sharding matters: keep >= 8
        # grid steps (>= 2 steps per TensorCore on v7x, deep pipeline on
        # single-TC v5e/v6e) while staying at the ~2 MiB block target.
        deep = [d for d in fits if bg // d >= 8]
        if deep:
            return max(deep)
    return max(fits)


def _sge_kernel(x_ref, sel_ref, selt_ref, wb_ref, o_ref, *, hw):
    # x_ref, o_ref : (r_blk, hw) tiles (channel rows on sublanes, spatial on lanes)
    # sel_ref      : (n_slices, r_blk) 0/1 selection matrix (resident)
    # selt_ref     : (r_blk, n_slices) its transpose (resident)
    # wb_ref       : (n_slices, 2) per-slice [weight, bias] (f32)
    x = x_ref[...].astype(jnp.float32)                          # (r_blk, hw)
    inv_hw = jnp.float32(1.0 / hw)

    # AdaptiveAvgPool2d(1): per-channel spatial mean (true hw extent, no padding).
    avg = jnp.sum(x, axis=-1, keepdims=True) * inv_hw           # (r_blk, 1)
    y = x * avg                                                  # (r_blk, hw)

    # Channel-sum within each (batch, group) slice on the otherwise-idle MXU
    # (keeps the sublane axis untouched -- no in-kernel relayout).
    sel = sel_ref[...]
    xn = jnp.dot(sel, y, preferred_element_type=jnp.float32)    # (n_slices, hw)

    # Spatial normalization (ddof=1 to match torch.std; eps added to std).
    mean_t = jnp.sum(xn, axis=-1, keepdims=True) * inv_hw
    t = xn - mean_t
    # hw == 1: torch.std(ddof=1) would give NaN/inf; we clamp the divisor instead.
    var = jnp.sum(t * t, axis=-1, keepdims=True) * jnp.float32(1.0 / max(hw - 1, 1))
    inv_std = pl.reciprocal(jnp.sqrt(var) + jnp.float32(1e-5))  # exact 1/std

    # Per-(batch, group) affine + sigmoid gate: (t/std)*w + b == t*(w/std) + b.
    wb = wb_ref[...]                                             # (n_slices, 2)
    w_s = wb[:, 0:1]
    b_s = wb[:, 1:2]
    gate = jax.nn.sigmoid(t * (inv_std * w_s) + b_s)             # (n_slices, hw)

    # Broadcast the gate back to channel rows (MXU) and apply.
    gate_rows = jnp.dot(selt_ref[...], gate, preferred_element_type=jnp.float32)
    o_ref[...] = (x * gate_rows).astype(o_ref.dtype)


def spatial_group_enhance(x, weight, bias, groups, *, block_bg=None):
    """x: (b, c, h, w) NCHW; weight/bias: (1, groups, 1, 1). Returns (b, c, h, w)."""
    b, c, h, w = x.shape
    assert c % groups == 0, "channels must be divisible by groups"
    cpg = c // groups
    bg = b * groups
    hw = h * w
    itemsize = jnp.dtype(x.dtype).itemsize

    if block_bg is None:
        block_bg = _choose_block_bg(bg, cpg, hw, x.dtype)
    assert bg % block_bg == 0
    num_blocks = bg // block_bg
    r_blk = block_bg * cpg                      # sublane-dense (or full extent)

    # Free contiguous reshape: no padding, no extra HBM passes.
    x2 = x.reshape(bg * cpg, hw)

    # Precomputed 0/1 selection matrices (resident in VMEM, DMA'd once).
    sel_np = np.kron(np.eye(block_bg, dtype=np.float32),
                     np.ones((1, cpg), dtype=np.float32))        # (block_bg, r_blk)
    sel = jnp.asarray(sel_np)
    sel_t = jnp.asarray(np.ascontiguousarray(sel_np.T))          # (r_blk, block_bg)

    # Per-(batch, group) [weight, bias] scalars, pre-grouped by grid block.
    w_per = jnp.tile(jnp.reshape(weight, (groups,)), (b,)).astype(jnp.float32)  # (bg,)
    b_per = jnp.tile(jnp.reshape(bias, (groups,)), (b,)).astype(jnp.float32)    # (bg,)
    wb = jnp.stack([w_per, b_per], axis=-1).reshape(num_blocks, block_bg, 2)

    n_elem = b * c * h * w
    cost = pl.CostEstimate(
        flops=10 * n_elem,
        transcendentals=bg * hw,
        bytes_accessed=2 * n_elem * itemsize,
    )

    kernel = functools.partial(_sge_kernel, hw=hw)

    out2 = pl.pallas_call(
        kernel,
        out_shape=jax.ShapeDtypeStruct((bg * cpg, hw), x.dtype),
        grid_spec=pltpu.PrefetchScalarGridSpec(
            num_scalar_prefetch=0,
            grid=(num_blocks,),
            in_specs=[
                pl.BlockSpec((r_blk, hw), lambda i: (i, 0)),           # x tile
                pl.BlockSpec((block_bg, r_blk), lambda i: (0, 0)),     # sel (resident)
                pl.BlockSpec((r_blk, block_bg), lambda i: (0, 0)),     # sel^T (resident)
                pl.BlockSpec((None, block_bg, 2), lambda i: (i, 0, 0)),  # [w, b] per block
            ],
            out_specs=pl.BlockSpec((r_blk, hw), lambda i: (i, 0)),
        ),
        compiler_params=pltpu.CompilerParams(
            dimension_semantics=("parallel",),
            vmem_limit_bytes=_VMEM_LIMIT_BYTES,
        ),
        cost_estimate=cost,
    )(x2, sel, sel_t, wb)

    return out2.reshape(b, c, h, w)


def sge_reference(x, weight, bias, groups):
    """Pure-JAX reference mirroring the PyTorch forward exactly."""
    b, c, h, w = x.shape
    xg = x.reshape(b * groups, c // groups, h, w)
    avg = jnp.mean(xg, axis=(2, 3), keepdims=True)
    xn = jnp.sum(xg * avg, axis=1, keepdims=True)
    t = xn.reshape(b * groups, -1)
    t = t - jnp.mean(t, axis=1, keepdims=True)
    std = jnp.std(t, axis=1, keepdims=True, ddof=1) + 1e-5
    t = t / std
    t = t.reshape(b, groups, h, w)
    t = t * weight + bias
    t = t.reshape(b * groups, 1, h, w)
    out = xg * jax.nn.sigmoid(t)
    return out.reshape(b, c, h, w)


if __name__ == "__main__":
    key = jax.random.PRNGKey(0)
    kx, kw, kb, kx2 = jax.random.split(key, 4)

    groups = 16

    # Test 1: module defaults (weight=0, bias=1).
    b, c, h, w = 2, 32, 16, 16
    x = jax.random.normal(kx, (b, c, h, w), dtype=jnp.float32)
    weight = jnp.zeros((1, groups, 1, 1), dtype=jnp.float32)
    bias = jnp.ones((1, groups, 1, 1), dtype=jnp.float32)
    out = jax.block_until_ready(spatial_group_enhance(x, weight, bias, groups))
    ref = sge_reference(x, weight, bias, groups)
    np.testing.assert_allclose(np.asarray(out), np.asarray(ref), rtol=1e-5, atol=1e-5)

    # Test 2: non-trivial weight/bias (exercises normalization + gate path).
    weight2 = jax.random.normal(kw, (1, groups, 1, 1), dtype=jnp.float32)
    bias2 = jax.random.normal(kb, (1, groups, 1, 1), dtype=jnp.float32)
    out2 = jax.block_until_ready(spatial_group_enhance(x, weight2, bias2, groups))
    ref2 = sge_reference(x, weight2, bias2, groups)
    np.testing.assert_allclose(np.asarray(out2), np.asarray(ref2), rtol=1e-4, atol=1e-4)

    # Test 3: h*w not a multiple of 128 (full-extent lane dim, masked stores).
    b3, c3, h3, w3 = 2, 64, 14, 14
    x3 = jax.random.normal(kx2, (b3, c3, h3, w3), dtype=jnp.float32)
    out3 = jax.block_until_ready(spatial_group_enhance(x3, weight2, bias2, groups))
    ref3 = sge_reference(x3, weight2, bias2, groups)
    np.testing.assert_allclose(np.asarray(out3), np.asarray(ref3), rtol=1e-4, atol=1e-4)

    # Test 4: forced multi-step grid (exercises the blocked/pipelined path).
    out4 = jax.block_until_ready(spatial_group_enhance(x3, weight2, bias2, groups,
                                                       block_bg=4))
    np.testing.assert_allclose(np.asarray(out4), np.asarray(ref3), rtol=1e-4, atol=1e-4)

    print("KERNEL_OK")
</pallas_src>

<mosaic_0001>
module attributes {stable_mosaic.version = 11 : i64} {
  func.func @_sge_kernel(%arg0: i32, %arg1: memref<64x256xf32, #tpu.memory_space<vmem>>, %arg2: memref<32x64xf32, #tpu.memory_space<vmem>>, %arg3: memref<64x32xf32, #tpu.memory_space<vmem>>, %arg4: memref<1x32x2xf32, #tpu.memory_space<vmem>>, %arg5: memref<64x256xf32, #tpu.memory_space<vmem>>) attributes {dimension_semantics = [#tpu.dimension_semantics<parallel>], iteration_bounds = array<i64: 1>, scalar_prefetch = 0 : i64, scratch_operands = 0 : i64, tpu.core_type = #tpu.core_type<tc>, window_params = [{transform_indices = @transform_0, window_bounds = array<i64: 64, 256>}, {pipeline_mode = #tpu.pipeline_mode<synchronous>, transform_indices = @transform_1, window_bounds = array<i64: 32, 64>}, {pipeline_mode = #tpu.pipeline_mode<synchronous>, transform_indices = @transform_2, window_bounds = array<i64: 64, 32>}, {transform_indices = @transform_3, window_bounds = array<i64: 1, 32, 2>}, {transform_indices = @transform_4, window_bounds = array<i64: 64, 256>}]} {
    %c0 = arith.constant 0 : index
    %c0_0 = arith.constant 0 : index
    %0 = vector.load %arg1[%c0, %c0_0] : memref<64x256xf32, #tpu.memory_space<vmem>>, vector<64x256xf32>
    %cst = arith.constant dense<0.000000e+00> : vector<64xf32>
    %1 = vector.multi_reduction <add>, %0, %cst [1] : vector<64x256xf32> to vector<64xf32>
    %2 = vector.shape_cast %1 : vector<64xf32> to vector<64x1xf32>
    %cst_1 = arith.constant 3.906250e-03 : f32
    %3 = vector.broadcast %cst_1 : f32 to vector<64x1xf32>
    %4 = arith.mulf %2, %3 : vector<64x1xf32>
    %5 = vector.broadcast %4 : vector<64x1xf32> to vector<64x256xf32>
    %6 = arith.mulf %0, %5 : vector<64x256xf32>
    %c0_2 = arith.constant 0 : index
    %c0_3 = arith.constant 0 : index
    %7 = vector.load %arg2[%c0_2, %c0_3] : memref<32x64xf32, #tpu.memory_space<vmem>>, vector<32x64xf32>
    %cst_4 = arith.constant dense<0.000000e+00> : vector<32x256xf32>
    %8 = tpu.matmul %7, %6, %cst_4 {dimension_numbers = #tpu.dot_dimension_numbers<[1], [0], [0], [1], [0, 0, 1, 1], [], []>} : vector<32x64xf32>, vector<64x256xf32>, vector<32x256xf32> -> vector<32x256xf32>
    %cst_5 = arith.constant dense<0.000000e+00> : vector<32xf32>
    %9 = vector.multi_reduction <add>, %8, %cst_5 [1] : vector<32x256xf32> to vector<32xf32>
    %10 = vector.shape_cast %9 : vector<32xf32> to vector<32x1xf32>
    %cst_6 = arith.constant 3.906250e-03 : f32
    %11 = vector.broadcast %cst_6 : f32 to vector<32x1xf32>
    %12 = arith.mulf %10, %11 : vector<32x1xf32>
    %13 = vector.broadcast %12 : vector<32x1xf32> to vector<32x256xf32>
    %14 = arith.subf %8, %13 : vector<32x256xf32>
    %15 = arith.mulf %14, %14 : vector<32x256xf32>
    %cst_7 = arith.constant dense<0.000000e+00> : vector<32xf32>
    %16 = vector.multi_reduction <add>, %15, %cst_7 [1] : vector<32x256xf32> to vector<32xf32>
    %17 = vector.shape_cast %16 : vector<32xf32> to vector<32x1xf32>
    %cst_8 = arith.constant 0.00392156886 : f32
    %18 = vector.broadcast %cst_8 : f32 to vector<32x1xf32>
    %19 = arith.mulf %17, %18 : vector<32x1xf32>
    %20 = math.sqrt %19 : vector<32x1xf32>
    %cst_9 = arith.constant 9.99999974E-6 : f32
    %21 = vector.broadcast %cst_9 : f32 to vector<32x1xf32>
    %22 = arith.addf %20, %21 : vector<32x1xf32>
    %23 = tpu.reciprocal %22 : vector<32x1xf32> -> vector<32x1xf32>
    %c0_10 = arith.constant 0 : index
    %c0_11 = arith.constant 0 : index
    %c0_12 = arith.constant 0 : index
    %24 = vector.load %arg4[%c0_10, %c0_11, %c0_12] : memref<1x32x2xf32, #tpu.memory_space<vmem>>, vector<1x32x2xf32>
    %25 = vector.shape_cast %24 : vector<1x32x2xf32> to vector<32x2xf32>
    %26 = vector.extract_strided_slice %25 {offsets = [0, 0], sizes = [32, 1], strides = [1, 1]} : vector<32x2xf32> to vector<32x1xf32>
    %27 = vector.extract_strided_slice %25 {offsets = [0, 1], sizes = [32, 1], strides = [1, 1]} : vector<32x2xf32> to vector<32x1xf32>
    %28 = arith.mulf %23, %26 : vector<32x1xf32>
    %29 = vector.broadcast %28 : vector<32x1xf32> to vector<32x256xf32>
    %30 = arith.mulf %14, %29 : vector<32x256xf32>
    %31 = vector.broadcast %27 : vector<32x1xf32> to vector<32x256xf32>
    %32 = arith.addf %30, %31 : vector<32x256xf32>
    %33 = arith.negf %32 : vector<32x256xf32>
    %34 = math.exp %33 : vector<32x256xf32>
    %cst_13 = arith.constant 1.000000e+00 : f32
    %35 = vector.broadcast %cst_13 : f32 to vector<32x256xf32>
    %36 = arith.addf %35, %34 : vector<32x256xf32>
    %37 = arith.divf %35, %36 : vector<32x256xf32>
    %c0_14 = arith.constant 0 : index
    %c0_15 = arith.constant 0 : index
    %38 = vector.load %arg3[%c0_14, %c0_15] : memref<64x32xf32, #tpu.memory_space<vmem>>, vector<64x32xf32>
    %cst_16 = arith.constant dense<0.000000e+00> : vector<64x256xf32>
    %39 = tpu.matmul %38, %37, %cst_16 {dimension_numbers = #tpu.dot_dimension_numbers<[1], [0], [0], [1], [0, 0, 1, 1], [], []>} : vector<64x32xf32>, vector<32x256xf32>, vector<64x256xf32> -> vector<64x256xf32>
    %40 = arith.mulf %0, %39 : vector<64x256xf32>
    %c0_17 = arith.constant 0 : index
    %c0_18 = arith.constant 0 : index
    %41 = vector.load %arg5[%c0_17, %c0_18] : memref<64x256xf32, #tpu.memory_space<vmem>>, vector<64x256xf32>
    tpu.vector_store %arg5[%c0_17, %c0_18], %40 {strides = array<i32>} : memref<64x256xf32, #tpu.memory_space<vmem>>, vector<64x256xf32>,
    return
  }
  func.func @transform_0(%arg0: i32) -> (i32, i32) {
    %c0_i32 = arith.constant 0 : i32
    %c0_i32_0 = arith.constant 0 : i32
    return %arg0, %c0_i32 : i32, i32
  }
  func.func @transform_1(%arg0: i32) -> (i32, i32) {
    %c0_i32 = arith.constant 0 : i32
    %c0_i32_0 = arith.constant 0 : i32
    %c0_i32_1 = arith.constant 0 : i32
    return %c0_i32, %c0_i32_0 : i32, i32
  }
  func.func @transform_2(%arg0: i32) -> (i32, i32) {
    %c0_i32 = arith.constant 0 : i32
    %c0_i32_0 = arith.constant 0 : i32
    %c0_i32_1 = arith.constant 0 : i32
    return %c0_i32, %c0_i32_0 : i32, i32
  }
  func.func @transform_3(%arg0: i32) -> (i32, i32, i32) {
    %c0_i32 = arith.constant 0 : i32
    %c0_i32_0 = arith.constant 0 : i32
    %c0_i32_1 = arith.constant 0 : i32
    return %arg0, %c0_i32, %c0_i32_0 : i32, i32, i32
  }
  func.func @transform_4(%arg0: i32) -> (i32, i32) {
    %c0_i32 = arith.constant 0 : i32
    %c0_i32_0 = arith.constant 0 : i32
    return %arg0, %c0_i32 : i32, i32
  }
}

</mosaic_0001>

<bundles_post_ra>
// kernel: tpu_custom_call.1
= control target key start
LH: loop header
LB: loop body
LE: loop exit
PB: predicated region body
PF: predicated region fallthrough
CT: control target
= control target key end

     0   :  { %9 = vsyncpa [#allocation3], 0  ;;  %s1036_s0 = inlined_call_operand.vmem [shape: f32[64,256], index: 0, kind: input, shape index: {}]   ;;  %s1037_s1 = inlined_call_operand.hbm [shape: f32[32,64], index: 1, kind: input, shape index: {}]   ;;  %s1038_s2 = inlined_call_operand.vmem [shape: f32[64,32], index: 2, kind: input, shape index: {}]   ;;  %s1039_s3 = inlined_call_operand.vmem [shape: f32[1,32,2], index: 3, kind: input, shape index: {}]   ;;  %s1040_s4 = inlined_call_operand.hbm [shape: f32[64,256], index: 4, kind: output, shape index: {}]  }
   0x1   :  { %10 = vsyncpa [#allocation4], 0  ;;  %s751_s15 = smov [#allocation2]   ;;  %s703_s19 = scalar_lea.hbm %s1037_s1, 512 }
   0x2   :  { %s18_s16 = sshll.u32 %s751_s15, 4  ;;  %p704_p0 = scmp.ne.s32.totalorder %s1037_s1, %s703_s19  ;;  %s19_s16 = int_to_ptr.vmem [resolvable:$true] %s18_s16 }
   0x3   :  { %p707_p1 = scmp.lt.u32.totalorder %s703_s19, %s1037_s1 }
   0x5   :  { %p709_p2 = pnand %p707_p1, %p704_p0 }
   0x7   :  { %712 = shalt.err (!%p709_p2)
}
   0x8   :  { %s713_s24 = scalar_lea.vmem %s19_s16, 512  ;;  %p718_p4 = scmp.lt.s32.totalorder %s19_s16, %s19_s16 }
   0x9   :  { %p714_p3 = scmp.ne.s32.totalorder %s19_s16, %s713_s24  ;;  %p719_p5 = scmp.lt.s32.totalorder %s713_s24, %s713_s24 }
   0xb   :  { %p720_p6 = por %p719_p5, %p718_p4 }
   0xd   :  { %p721_p7 = pnand %p720_p6, %p714_p3 }
   0xf   :  { %724 = shalt.err (!%p721_p7)
}
  0x10   :  { %s752_s25 = smov 128   ;;  %s753_s26 = smov 8  }
  0x11   :  { %24 = dma.hbm_to_vmem [thread:$0]  %s1037_s1, 512, %s19_s16, [#allocation3], %s752_s25, %s752_s25, %s753_s26  }
  0x12   :  { %747 = dma.done.wait [#allocation3], 512  }
  0x13   :  { %748 = vsyncadd [#allocation3], 4294966784  ;;  %v800_v0 = vld [vmem:[%s1036_s0 + $0x20] sm:$0xff]  ;;  %v805_v1 = vld [vmem:[%s1036_s0 + $0x28] sm:$0xff]  ;;  %v754_v24 = vmov 0.0   ;;  %vm100_vm0 = vcmask 523264  }
  0x14   :  { %v810_v2 = vld [vmem:[%s1036_s0] sm:$0xff]  ;;  %v54_v3 = vadd.f32 %v805_v1, %v800_v0  ;;  %v817_v4 = vld [vmem:[%s1036_s0 + $0x8] sm:$0xff]  ;;  %v822_v5 = vld [vmem:[%s1036_s0 + $0x30] sm:$0xff]  ;;  %177 = vmatprep.mubr.f32.mxu0 %v754_v24  ;;  %501 = vmatprep.mubr.f32.mxu1 %v754_v24  ;;  %vm406_vm9 = vcmask 261120  }
  0x15   :  { %v827_v6 = vld [vmem:[%s1036_s0 + $0x38] sm:$0xff]  ;;  %v48_v7 = vadd.f32 %v817_v4, %v810_v2  ;;  %v834_v8 = vld [vmem:[%s1036_s0 + $0x10] sm:$0xff]  ;;  %v858_v14 = vld [vmem:[%s1036_s0 + $0x40] sm:$0xff] }
  0x16   :  { %v839_v9 = vld [vmem:[%s1036_s0 + $0x18] sm:$0xff]  ;;  %55 = vadd.xlane.f32.xlu1 %v54_v3  ;;  %v57_v10 = vadd.f32 %v827_v6, %v822_v5  ;;  %v848_v12 = vld [vmem:[%s1036_s0 + $0x50] sm:$0xff]  ;;  %v863_v15 = vld [vmem:[%s1036_s0 + $0x48] sm:$0xff] }
  0x17   :  { %49 = vadd.xlane.f32.xlu0 %v48_v7  ;;  %v51_v11 = vadd.f32 %v839_v9, %v834_v8  ;;  %v853_v13 = vld [vmem:[%s1036_s0 + $0x58] sm:$0xff]  ;;  %v60_v17 = vadd.f32 %v863_v15, %v858_v14  ;;  %v872_v18 = vld [vmem:[%s1036_s0 + $0x70] sm:$0xff]  ;;  %v882_v20 = vld [vmem:[%s1036_s0 + $0x60] sm:$0xff] }
  0x18   :  { %v63_v16 = vadd.f32 %v853_v13, %v848_v12  ;;  %v877_v19 = vld [vmem:[%s1036_s0 + $0x78] sm:$0xff]  ;;  %v887_v21 = vld [vmem:[%s1036_s0 + $0x68] sm:$0xff]  ;;  %v96_v7 = vld [vmem:[#allocation2] sm:$0xff] }
  0x19   :  { %v69_v22 = vadd.f32 %v877_v19, %v872_v18  ;;  %v66_v23 = vadd.f32 %v887_v21, %v882_v20 }
  0x1a   :  { %58 = vadd.xlane.f32.xlu1 %v57_v10  ;;  %v97_v10 = vld [vmem:[#allocation2 + $0x8] sm:$0xff] }
  0x1b   :  { %52 = vadd.xlane.f32.xlu0 %v51_v11  ;;  %v98_v11 = vld [vmem:[#allocation2 + $0x10] sm:$0xff] }
  0x1e   :  { %64 = vadd.xlane.f32.xlu1 %v63_v16  ;;  %v99_v16 = vld [vmem:[#allocation2 + $0x18] sm:$0xff] }
  0x1f   :  { %61 = vadd.xlane.f32.xlu0 %v60_v17 }
  0x22   :  { %70 = vadd.xlane.f32.xlu1 %v69_v22 }
  0x23   :  { %67 = vadd.xlane.f32.xlu0 %v66_v23 }
  0xa3   :  { %v56_v25 = vpop.xlane.xlu1 %55 }
  0xa4   :  { %v50_v26 = vpop.xlane.xlu0 %49  ;;  %v74_v27 = vmul.f32 0.00390625, %v56_v25 }
  0xa5   :  { %v72_v28 = vmul.f32 0.00390625, %v50_v26 }
  0xa6   :  { %v85_v33 = vmul.f32 %v74_v27, %v805_v1  ;;  %v84_v45 = vmul.f32 %v74_v27, %v800_v0 }
  0xa7   :  { %v59_v29 = vpop.xlane.xlu1 %58  ;;  %v80_v34 = vmul.f32 %v72_v28, %v810_v2  ;;  %v81_v37 = vmul.f32 %v72_v28, %v817_v4 }
  0xa8   :  { %v75_v30 = vmul.f32 0.00390625, %v59_v29  ;;  %v53_v31 = vpop.xlane.xlu0 %52 }
  0xa9   :  { %v73_v32 = vmul.f32 0.00390625, %v53_v31 }
  0xaa   :  { %v87_v35 = vmul.f32 %v75_v30, %v827_v6  ;;  %v86_v46 = vmul.f32 %v75_v30, %v822_v5 }
  0xab   :  { %v82_v36 = vmul.f32 %v73_v32, %v834_v8  ;;  %v83_v38 = vmul.f32 %v73_v32, %v839_v9  ;;  %v65_v39 = vpop.xlane.xlu1 %64 }
  0xac   :  { %v77_v40 = vmul.f32 0.00390625, %v65_v39  ;;  %v62_v41 = vpop.xlane.xlu0 %61  ;;  %v617_v49 = vpack.c.bf16 %v87_v35, %v85_v33  ;;  %v619_v58 = vpack.c.bf16 %v86_v46, %v84_v45 }
  0xad   :  { %v613_v42 = vpack.c.bf16 %v83_v38, %v81_v37  ;;  %v615_v43 = vpack.c.bf16 %v82_v36, %v80_v34  ;;  %v76_v44 = vmul.f32 0.00390625, %v62_v41 }
  0xae   :  { %v91_v47 = vmul.f32 %v77_v40, %v853_v13  ;;  %v90_v51 = vmul.f32 %v77_v40, %v848_v12 }
  0xaf   :  { %614 = vmatprep.subr.bf16.mxu0 %v613_v42  ;;  %v89_v48 = vmul.f32 %v76_v44, %v863_v15  ;;  %v71_v50 = vpop.xlane.xlu1 %70  ;;  %v88_v52 = vmul.f32 %v76_v44, %v858_v14 }
  0xb0   :  { %616 = vmatpush1.bf16.msra.mxu0 %v615_v43  ;;  %v79_v53 = vmul.f32 0.00390625, %v71_v50  ;;  %v68_v54 = vpop.xlane.xlu0 %67 }
  0xb1   :  { %618 = vmatprep.subr.bf16.mxu0 %v617_v49  ;;  %v78_v55 = vmul.f32 0.00390625, %v68_v54  ;;  %v621_v56 = vpack.c.bf16 %v91_v47, %v89_v48  ;;  %v623_v62 = vpack.c.bf16 %v90_v51, %v88_v52 }
  0xb2   :  { %v95_v57 = vmul.f32 %v79_v53, %v877_v19  ;;  %v94_v60 = vmul.f32 %v79_v53, %v872_v18 }
  0xb3   :  { %v93_v59 = vmul.f32 %v78_v55, %v887_v21  ;;  %v92_v61 = vmul.f32 %v78_v55, %v882_v20 }
  0xb4   :  { %620 = vmatpush1.bf16.msra.mxu0 %v619_v58 }
  0xb5   :  { %622 = vmatprep.subr.bf16.mxu0 %v621_v56  ;;  %v625_v63 = vpack.c.bf16 %v95_v57, %v93_v59  ;;  %v627_v3 = vpack.c.bf16 %v94_v60, %v92_v61 }
  0xb8   :  { %624 = vmatpush1.bf16.msra.mxu0 %v623_v62  ;;  %v755_v62 = vmov 1  }
  0xb9   :  { %626 = vmatprep.subr.bf16.mxu0 %v625_v63  ;;  %651 = vset.pattern.permute.xlu1 %v755_v62  ;;  %v286_v63 = vld [vmem:[%s1039_s3] sm:$0xff] }
  0xbc   :  { %628 = vmatpush1.bf16.msra.mxu0 %v627_v3  ;;  %v287_v3 = vld [vmem:[%s1039_s3 + $0x8] sm:$0xff] }
  0xbf   :  { %593 = vmatmul.mubr.msk.f32.vlgmr.msra.gmra.mrb[0].mxu0 %vm100_vm0, %v96_v7  ;;  %v288_v7 = vld [vmem:[%s1039_s3 + $0x10] sm:$0xff] }
  0xc0   :  { %183 = vmatprep.mubr.f32.mxu0 %v754_v24 }
  0xc3   :  { %594 = vmatmul.mubr.msk.f32.gmra.mrb[2].mxu0 %vm100_vm0, %v97_v10  ;;  %v756_v10 = vmov 0  }
  0xc4   :  { %189 = vmatprep.mubr.f32.mxu0 %v754_v24  ;;  %650 = vset.pattern.permute.xlu0 %v756_v10 }
  0xc7   :  { %595 = vmatmul.mubr.msk.f32.gmra.mrb[4].mxu0 %vm100_vm0, %v98_v11 }
  0xc8   :  { %195 = vmatprep.mubr.f32.mxu0 %v754_v24 }
  0xcb   :  { %596 = vmatmul.mubr.msk.f32.gmra.mrb[6].mxu0 %vm100_vm0, %v99_v16 }
  0xcc   :  { %495 = vmatprep.mubr.f32.mxu0 %v754_v24 }
 0x192   :  { %v179_v17 = vpop.f32.mrb[0].mxu0 }
 0x193   :  { %v181_v22 = vpop.f32.mrb[1].mxu0 }
 0x194   :  { %v202_v23 = vadd.f32 %v181_v22, %v179_v17 }
 0x196   :  { %203 = vadd.xlane.f32.xlu0 %v202_v23  ;;  %v185_v25 = vpop.f32.mrb[2].mxu0 }
 0x197   :  { %v187_v26 = vpop.f32.mrb[3].mxu0 }
 0x198   :  { %v205_v27 = vadd.f32 %v187_v26, %v185_v25 }
 0x19a   :  { %206 = vadd.xlane.f32.xlu1 %v205_v27  ;;  %v191_v28 = vpop.f32.mrb[4].mxu0 }
 0x19b   :  { %v193_v29 = vpop.f32.mrb[5].mxu0 }
 0x19c   :  { %v208_v30 = vadd.f32 %v193_v29, %v191_v28 }
 0x19e   :  { %209 = vadd.xlane.f32.xlu0 %v208_v30  ;;  %v197_v31 = vpop.f32.mrb[6].mxu0 }
 0x19f   :  { %v199_v32 = vpop.f32.mrb[7].mxu0 }
 0x1a0   :  { %v211_v33 = vadd.f32 %v199_v32, %v197_v31 }
 0x1a2   :  { %212 = vadd.xlane.f32.xlu1 %v211_v33 }
 0x223   :  { %v204_v34 = vpop.xlane.xlu0 %203 }
 0x224   :  { %v214_v35 = vmul.f32 0.00390625, %v204_v34 }
 0x226   :  { %v915_v36 = vsub.f32 %v179_v17, %v214_v35  ;;  %v917_v37 = vsub.f32 %v181_v22, %v214_v35 }
 0x227   :  { %v207_v38 = vpop.xlane.xlu1 %206 }
 0x228   :  { %v215_v39 = vmul.f32 0.00390625, %v207_v38  ;;  %v226_v40 = vmul.f32 %v915_v36, %v915_v36  ;;  %v227_v41 = vmul.f32 %v917_v37, %v917_v37 }
 0x22a   :  { %v923_v42 = vsub.f32 %v185_v25, %v215_v39  ;;  %v925_v43 = vsub.f32 %v187_v26, %v215_v39  ;;  %v234_v44 = vadd.f32 %v227_v41, %v226_v40 }
 0x22b   :  { %v210_v45 = vpop.xlane.xlu0 %209 }
 0x22c   :  { %v216_v46 = vmul.f32 0.00390625, %v210_v45  ;;  %235 = vadd.xlane.f32.xlu0 %v234_v44  ;;  %v228_v47 = vmul.f32 %v923_v42, %v923_v42  ;;  %v229_v48 = vmul.f32 %v925_v43, %v925_v43 }
 0x22e   :  { %v931_v49 = vsub.f32 %v191_v28, %v216_v46  ;;  %v933_v50 = vsub.f32 %v193_v29, %v216_v46  ;;  %v237_v51 = vadd.f32 %v229_v48, %v228_v47 }
 0x22f   :  { %v213_v52 = vpop.xlane.xlu1 %212 }
 0x230   :  { %v217_v53 = vmul.f32 0.00390625, %v213_v52  ;;  %238 = vadd.xlane.f32.xlu1 %v237_v51  ;;  %v230_v54 = vmul.f32 %v931_v49, %v931_v49  ;;  %v231_v55 = vmul.f32 %v933_v50, %v933_v50 }
 0x232   :  { %v939_v56 = vsub.f32 %v197_v31, %v217_v53  ;;  %v941_v57 = vsub.f32 %v199_v32, %v217_v53  ;;  %v240_v58 = vadd.f32 %v231_v55, %v230_v54 }
 0x234   :  { %241 = vadd.xlane.f32.xlu0 %v240_v58  ;;  %v232_v59 = vmul.f32 %v939_v56, %v939_v56  ;;  %v233_v60 = vmul.f32 %v941_v57, %v941_v57 }
 0x236   :  { %v243_v61 = vadd.f32 %v233_v60, %v232_v59 }
 0x238   :  { %244 = vadd.xlane.f32.xlu1 %v243_v61 }
 0x249   :  { %324 = vperm.xlu1 %651, %v286_v63  }
 0x24d   :  { %329 = vperm.xlu1 %651, %v287_v3  }
 0x251   :  { %334 = vperm.xlu1 %651, %v288_v7  }
 0x255   :  { %652 = vset.pattern.permute.xlu1 %v756_v10 }
 0x2b9   :  { %v236_v11 = vpop.xlane.xlu0 %235 }
 0x2ba   :  { %v246_v16 = vmul.f32 0.003921569, %v236_v11 }
 0x2bc   :  { %655 = vrsqrt.f32 %v246_v16  ;;  %vm252_vm1 = vcmp.eq.f32.partialorder %v246_v16, inf  ;;  %v255_v30 = vand.u32 2147483648, %v246_v16  ;;  %vm254_vm2 = vcmp.eq.f32.partialorder %v246_v16, 0.0 }
 0x2bd   :  { %v239_v17 = vpop.xlane.xlu1 %238 }
 0x2be   :  { %v247_v22 = vmul.f32 0.003921569, %v239_v17 }
 0x2c0   :  { %657 = vrsqrt.f32 %v247_v22  ;;  %vm259_vm3 = vcmp.eq.f32.partialorder %v247_v22, inf  ;;  %v262_v38 = vand.u32 2147483648, %v247_v22  ;;  %vm261_vm4 = vcmp.eq.f32.partialorder %v247_v22, 0.0 }
 0x2c1   :  { %v242_v23 = vpop.xlane.xlu0 %241 }
 0x2c2   :  { %v248_v25 = vmul.f32 0.003921569, %v242_v23 }
 0x2c4   :  { %659 = vrsqrt.f32 %v248_v25  ;;  %vm266_vm5 = vcmp.eq.f32.partialorder %v248_v25, inf  ;;  %v269_v46 = vand.u32 2147483648, %v248_v25  ;;  %vm268_vm6 = vcmp.eq.f32.partialorder %v248_v25, 0.0 }
 0x2c5   :  { %v245_v26 = vpop.xlane.xlu1 %244 }
 0x2c6   :  { %v656_v27 = vpop.eup %655  ;;  %v249_v28 = vmul.f32 0.003921569, %v245_v26 }
 0x2c7   :  { %v251_v29 = vmul.f32 %v656_v27, %v246_v16 }
 0x2c8   :  { %661 = vrsqrt.f32 %v249_v28  ;;  %vm273_vm7 = vcmp.eq.f32.partialorder %v249_v28, inf  ;;  %v276_v54 = vand.u32 2147483648, %v249_v28  ;;  %vm275_vm8 = vcmp.eq.f32.partialorder %v249_v28, 0.0 }
 0x2c9   :  { %v253_v31 = vsel %vm252_vm1, %v246_v16, %v251_v29 }
 0x2ca   :  { %v658_v32 = vpop.eup %657  ;;  %v256_v33 = vsel %vm254_vm2, %v255_v30, %v253_v31 }
 0x2cb   :  { %v258_v34 = vmul.f32 %v658_v32, %v247_v22  ;;  %v278_v35 = vadd.f32 1e-05, %v256_v33 }
 0x2cd   :  { %663 = vrcp.f32 %v278_v35  ;;  %v260_v39 = vsel %vm259_vm3, %v247_v22, %v258_v34  ;;  %v289_v22 = vld [vmem:[%s1039_s3 + $0x18] sm:$0xff] }
 0x2ce   :  { %v660_v40 = vpop.eup %659  ;;  %v263_v41 = vsel %vm261_vm4, %v262_v38, %v260_v39 }
 0x2cf   :  { %v265_v44 = vmul.f32 %v660_v40, %v248_v25  ;;  %v279_v45 = vadd.f32 1e-05, %v263_v41 }
 0x2d1   :  { %665 = vrcp.f32 %v279_v45  ;;  %v267_v47 = vsel %vm266_vm5, %v248_v25, %v265_v44 }
 0x2d2   :  { %v662_v48 = vpop.eup %661  ;;  %v270_v51 = vsel %vm268_vm6, %v269_v46, %v267_v47 }
 0x2d3   :  { %v272_v52 = vmul.f32 %v662_v48, %v249_v28  ;;  %v280_v53 = vadd.f32 1e-05, %v270_v51 }
 0x2d5   :  { %667 = vrcp.f32 %v280_v53  ;;  %v274_v55 = vsel %vm273_vm7, %v249_v28, %v272_v52 }
 0x2d6   :  { %v277_v58 = vsel %vm275_vm8, %v276_v54, %v274_v55 }
 0x2d7   :  { %v664_v59 = vpop.eup %663  ;;  %v281_v60 = vadd.f32 1e-05, %v277_v58 }
 0x2d8   :  { %v290_v61 = vmul.f32 %v664_v59, %v286_v63  ;;  %v325_v63 = vpop.permute.xlu1 %324 }
 0x2d9   :  { %669 = vrcp.f32 %v281_v60 }
 0x2da   :  { %296 = vperm.xlu0 %650, %v290_v61  }
 0x2db   :  { %v666_v10 = vpop.eup %665 }
 0x2dc   :  { %v291_v11 = vmul.f32 %v666_v10, %v287_v3  ;;  %v330_v26 = vpop.permute.xlu1 %329 }
 0x2de   :  { %301 = vperm.xlu1 %652, %v291_v11   ;;  %654 = vset.pattern.permute.xlu0 %v755_v62 }
 0x2df   :  { %v668_v16 = vpop.eup %667 }
 0x2e0   :  { %v292_v17 = vmul.f32 %v668_v16, %v288_v7  ;;  %v335_v27 = vpop.permute.xlu1 %334 }
 0x2e2   :  { %306 = vperm.xlu1 %652, %v292_v17  }
 0x2e3   :  { %v670_v23 = vpop.eup %669 }
 0x2e4   :  { %v293_v25 = vmul.f32 %v670_v23, %v289_v22 }
 0x2e6   :  { %311 = vperm.xlu1 %652, %v293_v25  }
 0x2ea   :  { %653 = vset.pattern.permute.xlu1 %v755_v62 }
 0x2eb   :  { %339 = vperm.xlu1 %653, %v289_v22  }
 0x359   :  { %v297_v3 = vpop.permute.xlu0 %296 }
 0x35a   :  { %v314_v28 = vmul.f32 %v297_v3, %v915_v36  ;;  %v315_v29 = vmul.f32 %v297_v3, %v917_v37 }
 0x35c   :  { %v342_v7 = vadd.f32 %v325_v63, %v314_v28  ;;  %v343_v30 = vadd.f32 %v325_v63, %v315_v29 }
 0x35d   :  { %v302_v31 = vpop.permute.xlu1 %301 }
 0x35e   :  { %v597_v32 = vmul.f32 -1.442695, %v342_v7  ;;  %v598_v33 = vmul.f32 -1.442695, %v343_v30  ;;  %v316_v34 = vmul.f32 %v302_v31, %v923_v42  ;;  %v317_v35 = vmul.f32 %v302_v31, %v925_v43 }
 0x360   :  { %671 = vpow2.f32 %v597_v32  ;;  %v344_v62 = vadd.f32 %v330_v26, %v316_v34  ;;  %v345_v38 = vadd.f32 %v330_v26, %v317_v35 }
 0x361   :  { %673 = vpow2.f32 %v598_v33  ;;  %v307_v39 = vpop.permute.xlu1 %306 }
 0x362   :  { %v599_v40 = vmul.f32 -1.442695, %v344_v62  ;;  %v600_v41 = vmul.f32 -1.442695, %v345_v38  ;;  %v318_v36 = vmul.f32 %v307_v39, %v931_v49  ;;  %v319_v37 = vmul.f32 %v307_v39, %v933_v50  ;;  %v399_v62 = vld [vmem:[%s1038_s2 + $0x8] sm:$0xff]  ;;  %v398_v38 = vld [vmem:[%s1038_s2] sm:$0xff] }
 0x363   :  { %v400_v39 = vld [vmem:[%s1038_s2 + $0x10] sm:$0xff] }
 0x364   :  { %675 = vpow2.f32 %v599_v40  ;;  %v346_v44 = vadd.f32 %v335_v27, %v318_v36  ;;  %v347_v45 = vadd.f32 %v335_v27, %v319_v37  ;;  %v401_v40 = vld [vmem:[%s1038_s2 + $0x18] sm:$0xff]  ;;  %v403_v36 = vld [vmem:[%s1038_s2 + $0x28] sm:$0xff]  ;;  %v404_v37 = vld [vmem:[%s1038_s2 + $0x30] sm:$0xff] }
 0x365   :  { %677 = vpow2.f32 %v600_v41  ;;  %v312_v46 = vpop.permute.xlu1 %311  ;;  %v402_v41 = vld [vmem:[%s1038_s2 + $0x20] sm:$0xff] }
 0x366   :  { %v601_v47 = vmul.f32 -1.442695, %v346_v44  ;;  %v602_v42 = vmul.f32 -1.442695, %v347_v45  ;;  %v320_v43 = vmul.f32 %v312_v46, %v939_v56  ;;  %v321_v48 = vmul.f32 %v312_v46, %v941_v57  ;;  %v405_v44 = vld [vmem:[%s1038_s2 + $0x38] sm:$0xff]  ;;  %s757_s2 = smov [#allocation5]  }
 0x367   :  { %s581_s29 = sshll.u32 %s757_s2, 4  ;;  %s582_s29 = int_to_ptr.vmem [resolvable:$true] %s581_s29 }
 0x368   :  { %679 = vpow2.f32 %v601_v47  ;;  %s725_s30 = scalar_lea.vmem %s582_s29, 2048  ;;  %p730_p9 = scmp.lt.s32.totalorder %s582_s29, %s582_s29 }
 0x369   :  { %681 = vpow2.f32 %v602_v42  ;;  %p726_p8 = scmp.ne.s32.totalorder %s582_s29, %s725_s30  ;;  %p731_p10 = scmp.lt.s32.totalorder %s725_s30, %s725_s30 }
 0x36a   :  { %v672_v51 = vpop.eup %671  ;;  %v340_v52 = vpop.permute.xlu1 %339 }
 0x36b   :  { %v674_v53 = vpop.eup %673  ;;  %v374_v54 = vadd.f32 1.0, %v672_v51  ;;  %v348_v49 = vadd.f32 %v340_v52, %v320_v43  ;;  %v349_v55 = vadd.f32 %v340_v52, %v321_v48  ;;  %p732_p11 = por %p731_p10, %p730_p9 }
 0x36c   :  { %v375_v50 = vadd.f32 1.0, %v674_v53 }
 0x36d   :  { %683 = vrcp.f32 %v374_v54  ;;  %v603_v58 = vmul.f32 -1.442695, %v348_v49  ;;  %v604_v59 = vmul.f32 -1.442695, %v349_v55  ;;  %p733_p12 = pnand %p732_p11, %p726_p8 }
 0x36e   :  { %v676_v60 = vpop.eup %675  ;;  %685 = vrcp.f32 %v375_v50 }
 0x36f   :  { %v678_v61 = vpop.eup %677  ;;  %v376_v10 = vadd.f32 1.0, %v676_v60  ;;  %687 = vpow2.f32 %v603_v58 }
 0x370   :  { %v377_v11 = vadd.f32 1.0, %v678_v61  ;;  %689 = vpow2.f32 %v604_v59 }
 0x371   :  { %691 = vrcp.f32 %v376_v10 }
 0x372   :  { %693 = vrcp.f32 %v377_v11  ;;  %v680_v56 = vpop.eup %679 }
 0x373   :  { %v682_v57 = vpop.eup %681  ;;  %v378_v16 = vadd.f32 1.0, %v680_v56 }
 0x374   :  { %v379_v22 = vadd.f32 1.0, %v682_v57 }
 0x375   :  { %695 = vrcp.f32 %v378_v16 }
 0x376   :  { %697 = vrcp.f32 %v379_v22 }
 0x377   :  { %v684_v17 = vpop.eup %683 }
 0x378   :  { %v686_v23 = vpop.eup %685 }
 0x379   :  { %v688_v25 = vpop.eup %687 }
 0x37a   :  { %v690_v63 = vpop.eup %689  ;;  %v380_v26 = vadd.f32 1.0, %v688_v25 }
 0x37b   :  { %v692_v27 = vpop.eup %691  ;;  %v381_v3 = vadd.f32 1.0, %v690_v63 }
 0x37c   :  { %v694_v28 = vpop.eup %693  ;;  %699 = vrcp.f32 %v380_v26  ;;  %v631_v29 = vpack.c.bf16 %v692_v27, %v684_v17 }
 0x37d   :  { %701 = vrcp.f32 %v381_v3  ;;  %v629_v7 = vpack.c.bf16 %v694_v28, %v686_v23 }
 0x37f   :  { %630 = vmatprep.subr.bf16.mxu0 %v629_v7  ;;  %637 = vmatprep.subr.bf16.mxu1 %v629_v7  ;;  %v696_v30 = vpop.eup %695 }
 0x380   :  { %632 = vmatpush1.bf16.msra.mxu0 %v631_v29  ;;  %639 = vmatpush1.bf16.msra.mxu1 %v631_v29  ;;  %v698_v31 = vpop.eup %697 }
 0x386   :  { %v700_v32 = vpop.eup %699 }
 0x387   :  { %v702_v33 = vpop.eup %701  ;;  %v635_v34 = vpack.c.bf16 %v700_v32, %v696_v30 }
 0x388   :  { %v633_v35 = vpack.c.bf16 %v702_v33, %v698_v31 }
 0x38a   :  { %634 = vmatprep.subr.bf16.mxu0 %v633_v35  ;;  %638 = vmatprep.subr.bf16.mxu1 %v633_v35 }
 0x38b   :  { %636 = vmatpush1.bf16.msra.mxu0 %v635_v34  ;;  %640 = vmatpush1.bf16.msra.mxu1 %v635_v34 }
 0x38e   :  { %606 = vmatmul.mubr.msk.f32.vlgmr.msra.gmra.mrb[0].mxu1 %vm406_vm9, %v399_v62  ;;  %605 = vmatmul.mubr.msk.f32.vlgmr.msra.gmra.mrb[8].mxu0 %vm406_vm9, %v398_v38 }
 0x38f   :  { %507 = vmatprep.mubr.f32.mxu1 %v754_v24 }
 0x392   :  { %607 = vmatmul.mubr.msk.f32.gmra.mrb[2].mxu1 %vm406_vm9, %v400_v39 }
 0x393   :  { %513 = vmatprep.mubr.f32.mxu1 %v754_v24 }
 0x396   :  { %608 = vmatmul.mubr.msk.f32.gmra.mrb[4].mxu1 %vm406_vm9, %v401_v40 }
 0x397   :  { %519 = vmatprep.mubr.f32.mxu1 %v754_v24 }
 0x39a   :  { %609 = vmatmul.mubr.msk.f32.gmra.mrb[6].mxu1 %vm406_vm9, %v402_v41 }
 0x39b   :  { %525 = vmatprep.mubr.f32.mxu1 %v754_v24 }
 0x39e   :  { %610 = vmatmul.mubr.msk.f32.gmra.mrb[8].mxu1 %vm406_vm9, %v403_v36 }
 0x39f   :  { %531 = vmatprep.mubr.f32.mxu1 %v754_v24 }
 0x3a2   :  { %611 = vmatmul.mubr.msk.f32.gmra.mrb[10].mxu1 %vm406_vm9, %v404_v37 }
 0x3a3   :  { %537 = vmatprep.mubr.f32.mxu1 %v754_v24 }
 0x3a6   :  { %612 = vmatmul.mubr.msk.f32.gmra.mrb[12].mxu1 %vm406_vm9, %v405_v44 }
 0x461   :  { %v503_v45 = vpop.f32.mrb[0].mxu1  ;;  %v497_v46 = vpop.f32.mrb[8].mxu0 }
 0x462   :  { %v546_v47 = vmul.f32 %v503_v45, %v834_v8  ;;  %v505_v42 = vpop.f32.mrb[1].mxu1  ;;  %v544_v43 = vmul.f32 %v497_v46, %v810_v2  ;;  %v499_v48 = vpop.f32.mrb[9].mxu0 }
 0x463   :  { %v547_v51 = vmul.f32 %v505_v42, %v839_v9  ;;  %v545_v52 = vmul.f32 %v499_v48, %v817_v4 }
 0x464   :  { %562 = vst [vmem:[#allocation5 + $0x10] sm:$0xff] %v546_v47  ;;  %560 = vst [vmem:[#allocation5] sm:$0xff] %v544_v43 }
 0x465   :  { %563 = vst [vmem:[#allocation5 + $0x18] sm:$0xff] %v547_v51  ;;  %v509_v24 = vpop.f32.mrb[2].mxu1  ;;  %561 = vst [vmem:[#allocation5 + $0x8] sm:$0xff] %v545_v52 }
 0x466   :  { %v548_v53 = vmul.f32 %v509_v24, %v800_v0  ;;  %v511_v54 = vpop.f32.mrb[3].mxu1 }
 0x467   :  { %v549_v49 = vmul.f32 %v511_v54, %v805_v1 }
 0x468   :  { %564 = vst [vmem:[#allocation5 + $0x20] sm:$0xff] %v548_v53 }
 0x469   :  { %565 = vst [vmem:[#allocation5 + $0x28] sm:$0xff] %v549_v49  ;;  %v515_v8 = vpop.f32.mrb[4].mxu1 }
 0x46a   :  { %v550_v2 = vmul.f32 %v515_v8, %v822_v5  ;;  %v517_v55 = vpop.f32.mrb[5].mxu1 }
 0x46b   :  { %v551_v9 = vmul.f32 %v517_v55, %v827_v6 }
 0x46c   :  { %566 = vst [vmem:[#allocation5 + $0x30] sm:$0xff] %v550_v2 }
 0x46d   :  { %567 = vst [vmem:[#allocation5 + $0x38] sm:$0xff] %v551_v9  ;;  %v521_v4 = vpop.f32.mrb[6].mxu1 }
 0x46e   :  { %v552_v50 = vmul.f32 %v521_v4, %v858_v14  ;;  %v523_v58 = vpop.f32.mrb[7].mxu1 }
 0x46f   :  { %v553_v59 = vmul.f32 %v523_v58, %v863_v15 }
 0x470   :  { %568 = vst [vmem:[#allocation5 + $0x40] sm:$0xff] %v552_v50 }
 0x471   :  { %569 = vst [vmem:[#allocation5 + $0x48] sm:$0xff] %v553_v59  ;;  %v527_v0 = vpop.f32.mrb[8].mxu1 }
 0x472   :  { %v554_v1 = vmul.f32 %v527_v0, %v848_v12  ;;  %v529_v60 = vpop.f32.mrb[9].mxu1 }
 0x473   :  { %v555_v61 = vmul.f32 %v529_v60, %v853_v13 }
 0x474   :  { %570 = vst [vmem:[#allocation5 + $0x50] sm:$0xff] %v554_v1 }
 0x475   :  { %571 = vst [vmem:[#allocation5 + $0x58] sm:$0xff] %v555_v61  ;;  %v533_v5 = vpop.f32.mrb[10].mxu1 }
 0x476   :  { %v556_v6 = vmul.f32 %v533_v5, %v882_v20  ;;  %v535_v10 = vpop.f32.mrb[11].mxu1 }
 0x477   :  { %v557_v11 = vmul.f32 %v535_v10, %v887_v21 }
 0x478   :  { %572 = vst [vmem:[#allocation5 + $0x60] sm:$0xff] %v556_v6 }
 0x479   :  { %573 = vst [vmem:[#allocation5 + $0x68] sm:$0xff] %v557_v11  ;;  %v539_v14 = vpop.f32.mrb[12].mxu1 }
 0x47a   :  { %v558_v15 = vmul.f32 %v539_v14, %v872_v18  ;;  %v541_v56 = vpop.f32.mrb[13].mxu1 }
 0x47b   :  { %v559_v12 = vmul.f32 %v541_v56, %v877_v19 }
 0x47c   :  { %574 = vst [vmem:[#allocation5 + $0x70] sm:$0xff] %v558_v15 }
 0x47d   :  { %575 = vst [vmem:[#allocation5 + $0x78] sm:$0xff] %v559_v12 }
 0x47e   :  { %736 = shalt.err (!%p733_p12)
}
 0x47f   :  { %s737_s7 = scalar_lea.hbm %s1040_s4, 2048 }
 0x480   :  { %p738_p13 = scmp.ne.s32.totalorder %s1040_s4, %s737_s7  ;;  %p741_p0 = scmp.lt.u32.totalorder %s737_s7, %s1040_s4 }
 0x482   :  { %p743_p1 = pnand %p741_p0, %p738_p13 }
 0x484   :  { %746 = shalt.err (!%p743_p1)
}
 0x485   :  { %s758_s10 = smov 256   ;;  %s759_s11 = smov 16  }
 0x486   :  { %587 = dma.vmem_to_hbm [thread:$0]  %s582_s29, 2048, %s1040_s4, [#allocation4], %s758_s10, %s758_s10, %s759_s11  }
 0x487   :  { %749 = dma.done.wait [#allocation4], 2048  }
 0x488   :  { %750 = vsyncadd [#allocation4], 4294965248 }
 0x489   :  { %591 = vsyncpa [#allocation3], 1 }
 0x48a   :  { %592 = vsyncpa [#allocation4], 1 }

</bundles_post_ra>
